<compile_context>
chip_gen: v5e
topology: v5e:2x2
jax: 0.10.0
libtpu: 0.0.40
codegen_flags: <defaults>
</compile_context>

<pallas_src>
import functools
import math

import jax
import jax.numpy as jnp
from jax.experimental import pallas as pl
from jax.experimental.pallas import tpu as pltpu

LANES = 128
SUBLANES = 8
MAX_TILE_ROWS = 1024                 # (1024,128) f32 tile = 512 KiB / input / buffer
LOGIT_THRESHOLD = math.log(0.25)     # sigmoid(x) >= 0.2  <=>  x >= log(0.25)


def _num_tensorcores():
    """Best-effort TensorCore count (2 on v7x-style chips, else 1)."""
    try:
        info = pltpu.get_tpu_info()
    except Exception:
        return 1
    for attr in ("num_cores", "num_tensorcores", "tensorcore_count", "core_count"):
        v = getattr(info, attr, None)
        if isinstance(v, int) and v >= 1:
            return int(v)
    return 1


def _iou_partial_kernel(out_ref, tgt_ref, and_ref, or_ref, *,
                        rows, tile_rows, steps_per_core, needs_mask):
    """Accumulate (8,128) int32 partial sums of AND / OR over the stream."""
    c = pl.program_id(0)
    i = pl.program_id(1)

    @pl.when(i == 0)
    def _():
        and_ref[...] = jnp.zeros_like(and_ref)
        or_ref[...] = jnp.zeros_like(or_ref)

    # Hot path: one f32 cast + compare on the raw logits (sigmoid folded into
    # the threshold) and one int cast of the target.  All VPU, hidden under
    # the HBM stream.
    pred = out_ref[...].astype(jnp.float32) >= LOGIT_THRESHOLD
    t_val = tgt_ref[...].astype(jnp.int32)        # truncation, matches .type(int64)

    if needs_mask:
        # Mask rows past the end of the valid data (partial last block and any
        # clamped/duplicated block from the core split).  Trace-time gated, so
        # fully-even inputs pay nothing for it.
        row0 = (c * steps_per_core + i) * tile_rows
        row_ids = jax.lax.broadcasted_iota(jnp.int32, (tile_rows, LANES), 0) + row0
        valid = row_ids < rows
        o_bin = (valid & pred).astype(jnp.int32)
        t_bin = jnp.where(valid, t_val, 0)
    else:
        o_bin = pred.astype(jnp.int32)
        t_bin = t_val

    # Per-step in-register reduction: (tile_rows,128) -> (8,128) with pure
    # vreg adds (sum over the leading axis; sublane/lane layout untouched).
    groups = tile_rows // SUBLANES
    and_tile = (o_bin & t_bin).reshape(groups, SUBLANES, LANES)
    or_tile = (o_bin | t_bin).reshape(groups, SUBLANES, LANES)

    and_ref[...] += jnp.sum(and_tile, axis=0)
    or_ref[...] += jnp.sum(or_tile, axis=0)


def loss_iou_pallas(output, target):
    """JAX/Pallas equivalent of Loss_iou.forward. Returns a float32 scalar."""
    assert output.shape == target.shape
    total = int(output.size)
    assert total > 0

    out_flat = output.reshape(-1)      # view-only (no dtype change, no pad)
    tgt_flat = target.reshape(-1)

    rows = total // LANES
    inter = jnp.int32(0)
    union = jnp.int32(0)

    main = rows * LANES if rows >= SUBLANES else 0
    if main:
        out_main = out_flat if main == total else out_flat[:main]
        tgt_main = tgt_flat if main == total else tgt_flat[:main]
        out2d = out_main.reshape(rows, LANES)
        tgt2d = tgt_main.reshape(rows, LANES)

        # Largest streaming tile that never exceeds the array (multiple of 8).
        tile_rows = min(MAX_TILE_ROWS, (rows // SUBLANES) * SUBLANES)
        n_blocks = pl.cdiv(rows, tile_rows)

        # 2-way TensorCore split only on chips that actually have 2 TCs.
        cores = 2 if (_num_tensorcores() >= 2 and n_blocks >= 2) else 1
        steps_per_core = pl.cdiv(n_blocks, cores)
        needs_mask = (cores * steps_per_core * tile_rows != rows)
        last_block = n_blocks - 1

        def row_map(c, i):
            idx = c * steps_per_core + i
            # Clamp so an over-allocated grid slot re-reads the last real
            # block; its contribution is zeroed by the in-kernel row mask.
            return (jnp.minimum(idx, last_block), 0)

        kernel = functools.partial(
            _iou_partial_kernel,
            rows=rows, tile_rows=tile_rows,
            steps_per_core=steps_per_core, needs_mask=needs_mask)

        and_part, or_part = pl.pallas_call(
            kernel,
            out_shape=(
                jax.ShapeDtypeStruct((cores * SUBLANES, LANES), jnp.int32),
                jax.ShapeDtypeStruct((cores * SUBLANES, LANES), jnp.int32),
            ),
            grid_spec=pltpu.PrefetchScalarGridSpec(
                num_scalar_prefetch=0,
                grid=(cores, steps_per_core),
                in_specs=[
                    pl.BlockSpec((tile_rows, LANES), row_map),
                    pl.BlockSpec((tile_rows, LANES), row_map),
                ],
                # Each core owns one resident (8,128) partial-sums block per
                # output, accumulated across the (reduction) step axis.
                out_specs=[
                    pl.BlockSpec((SUBLANES, LANES), lambda c, i: (c, 0)),
                    pl.BlockSpec((SUBLANES, LANES), lambda c, i: (c, 0)),
                ],
            ),
            compiler_params=pltpu.CompilerParams(
                dimension_semantics=("parallel", "arbitrary"),
                vmem_limit_bytes=32 * 1024 * 1024,
            ),
        )(out2d, tgt2d)

        inter = inter + jnp.sum(and_part)
        union = union + jnp.sum(or_part)

    if main < total:
        # Tiny tail (< 1024 elements): plain JAX, avoids any full-array pad.
        o_t = out_flat[main:]
        t_t = tgt_flat[main:]
        ob = (jax.nn.sigmoid(o_t.astype(jnp.float32)) >= 0.2).astype(jnp.int32)
        tb = t_t.astype(jnp.int32)
        inter = inter + jnp.sum(ob & tb)
        union = union + jnp.sum(ob | tb)

    # torch.mean of a 0-d tensor is the tensor itself.
    return jnp.float32(1.0) - inter.astype(jnp.float32) / union.astype(jnp.float32)


def _reference(output, target):
    """Pure-JAX reference mirroring the PyTorch semantics."""
    o = jax.nn.sigmoid(output.astype(jnp.float32))
    o = jnp.where(o >= 0.2, 1, 0).astype(jnp.int32)
    t = target.astype(jnp.int32)
    union = jnp.sum(o | t).astype(jnp.float32)
    inter = jnp.sum(o & t).astype(jnp.float32)
    return jnp.float32(1.0) - inter / union


if __name__ == "__main__":
    key = jax.random.PRNGKey(0)
    k1, k2, k3, k4 = jax.random.split(key, 4)

    loss_fn = jax.jit(loss_iou_pallas)

    # Small NCHW-shaped logits and a binary target mask (128-divisible).
    x = jax.random.normal(k1, (2, 4, 16, 16), dtype=jnp.float32)
    tgt = (jax.random.uniform(k2, (2, 4, 16, 16)) > 0.5).astype(jnp.float32)
    loss = jax.block_until_ready(loss_fn(x, tgt))
    ref = jax.block_until_ready(_reference(x, tgt))
    assert jnp.allclose(loss, ref, atol=1e-6), (loss, ref)

    # Native bf16 logits (streamed without any wrapper-side f32 upcast).
    x_bf = x.astype(jnp.bfloat16)
    loss_bf = jax.block_until_ready(loss_fn(x_bf, tgt))
    ref_bf = jax.block_until_ready(_reference(x_bf, tgt))
    assert jnp.allclose(loss_bf, ref_bf, atol=1e-6), (loss_bf, ref_bf)

    # Odd shape: exercises the in-kernel row mask + plain-JAX tail path.
    x2 = jax.random.normal(k3, (3, 5, 17, 9), dtype=jnp.float32)
    tgt2 = (jax.random.uniform(k4, (3, 5, 17, 9)) > 0.5).astype(jnp.float32)
    loss2 = jax.block_until_ready(loss_fn(x2, tgt2))
    ref2 = jax.block_until_ready(_reference(x2, tgt2))
    assert jnp.allclose(loss2, ref2, atol=1e-6), (loss2, ref2)

    print("KERNEL_OK")
</pallas_src>

<mosaic_0001>
module attributes {stable_mosaic.version = 11 : i64} {
  func.func @_iou_partial_kernel(%arg0: i32, %arg1: i32, %arg2: memref<16x128xf32, #tpu.memory_space<vmem>>, %arg3: memref<16x128xf32, #tpu.memory_space<vmem>>, %arg4: memref<8x128xi32, #tpu.memory_space<vmem>>, %arg5: memref<8x128xi32, #tpu.memory_space<vmem>>) attributes {dimension_semantics = [#tpu.dimension_semantics<parallel>, #tpu.dimension_semantics<arbitrary>], iteration_bounds = array<i64: 1, 1>, scalar_prefetch = 0 : i64, scratch_operands = 0 : i64, tpu.core_type = #tpu.core_type<tc>, window_params = [{transform_indices = @transform_0, window_bounds = array<i64: 16, 128>}, {transform_indices = @transform_1, window_bounds = array<i64: 16, 128>}, {transform_indices = @transform_2, window_bounds = array<i64: 8, 128>}, {transform_indices = @transform_3, window_bounds = array<i64: 8, 128>}]} {
    %c0_i32 = arith.constant 0 : i32
    %0 = arith.cmpi eq, %arg1, %c0_i32 : i32
    %1 = arith.extui %0 : i1 to i32
    %c0_i32_0 = arith.constant 0 : i32
    %2 = arith.cmpi ne, %1, %c0_i32_0 : i32
    scf.if %2 {
      %c0_i32_14 = arith.constant 0 : i32
      %21 = vector.broadcast %c0_i32_14 : i32 to vector<8x128xi32>
      %c0_15 = arith.constant 0 : index
      %c0_16 = arith.constant 0 : index
      %22 = vector.load %arg4[%c0_15, %c0_16] : memref<8x128xi32, #tpu.memory_space<vmem>>, vector<8x128xi32>
      tpu.vector_store %arg4[%c0_15, %c0_16], %21 {strides = array<i32>} : memref<8x128xi32, #tpu.memory_space<vmem>>, vector<8x128xi32>,
      %c0_i32_17 = arith.constant 0 : i32
      %23 = vector.broadcast %c0_i32_17 : i32 to vector<8x128xi32>
      %c0_18 = arith.constant 0 : index
      %c0_19 = arith.constant 0 : index
      %24 = vector.load %arg5[%c0_18, %c0_19] : memref<8x128xi32, #tpu.memory_space<vmem>>, vector<8x128xi32>
      tpu.vector_store %arg5[%c0_18, %c0_19], %23 {strides = array<i32>} : memref<8x128xi32, #tpu.memory_space<vmem>>, vector<8x128xi32>,
    } else {
    }
    %c0 = arith.constant 0 : index
    %c0_1 = arith.constant 0 : index
    %3 = vector.load %arg2[%c0, %c0_1] : memref<16x128xf32, #tpu.memory_space<vmem>>, vector<16x128xf32>
    %cst = arith.constant -1.38629436 : f32
    %4 = vector.broadcast %cst : f32 to vector<16x128xf32>
    %5 = arith.cmpf oge, %3, %4 : vector<16x128xf32>
    %c0_2 = arith.constant 0 : index
    %c0_3 = arith.constant 0 : index
    %6 = vector.load %arg3[%c0_2, %c0_3] : memref<16x128xf32, #tpu.memory_space<vmem>>, vector<16x128xf32>
    %7 = arith.fptosi %6 : vector<16x128xf32> to vector<16x128xi32>
    %8 = arith.extui %5 : vector<16x128xi1> to vector<16x128xi32>
    %9 = arith.andi %8, %7 : vector<16x128xi32>
    %10 = vector.shape_cast %9 : vector<16x128xi32> to vector<2x8x128xi32>
    %11 = arith.ori %8, %7 : vector<16x128xi32>
    %12 = vector.shape_cast %11 : vector<16x128xi32> to vector<2x8x128xi32>
    %c0_4 = arith.constant 0 : index
    %c0_5 = arith.constant 0 : index
    %13 = vector.load %arg4[%c0_4, %c0_5] : memref<8x128xi32, #tpu.memory_space<vmem>>, vector<8x128xi32>
    %cst_6 = arith.constant dense<0> : vector<8x128xi32>
    %14 = vector.multi_reduction <add>, %10, %cst_6 [0] : vector<2x8x128xi32> to vector<8x128xi32>
    %15 = arith.addi %13, %14 : vector<8x128xi32>
    %c0_7 = arith.constant 0 : index
    %c0_8 = arith.constant 0 : index
    %16 = vector.load %arg4[%c0_7, %c0_8] : memref<8x128xi32, #tpu.memory_space<vmem>>, vector<8x128xi32>
    tpu.vector_store %arg4[%c0_7, %c0_8], %15 {strides = array<i32>} : memref<8x128xi32, #tpu.memory_space<vmem>>, vector<8x128xi32>,
    %c0_9 = arith.constant 0 : index
    %c0_10 = arith.constant 0 : index
    %17 = vector.load %arg5[%c0_9, %c0_10] : memref<8x128xi32, #tpu.memory_space<vmem>>, vector<8x128xi32>
    %cst_11 = arith.constant dense<0> : vector<8x128xi32>
    %18 = vector.multi_reduction <add>, %12, %cst_11 [0] : vector<2x8x128xi32> to vector<8x128xi32>
    %19 = arith.addi %17, %18 : vector<8x128xi32>
    %c0_12 = arith.constant 0 : index
    %c0_13 = arith.constant 0 : index
    %20 = vector.load %arg5[%c0_12, %c0_13] : memref<8x128xi32, #tpu.memory_space<vmem>>, vector<8x128xi32>
    tpu.vector_store %arg5[%c0_12, %c0_13], %19 {strides = array<i32>} : memref<8x128xi32, #tpu.memory_space<vmem>>, vector<8x128xi32>,
    return
  }
  func.func @transform_0(%arg0: i32, %arg1: i32) -> (i32, i32) {
    %c1_i32 = arith.constant 1 : i32
    %0 = arith.muli %arg0, %c1_i32 : i32
    %1 = arith.addi %0, %arg1 : i32
    %c0_i32 = arith.constant 0 : i32
    %2 = arith.minsi %1, %c0_i32 : i32
    %c0_i32_0 = arith.constant 0 : i32
    %c0_i32_1 = arith.constant 0 : i32
    return %2, %c0_i32_0 : i32, i32
  }
  func.func @transform_1(%arg0: i32, %arg1: i32) -> (i32, i32) {
    %c1_i32 = arith.constant 1 : i32
    %0 = arith.muli %arg0, %c1_i32 : i32
    %1 = arith.addi %0, %arg1 : i32
    %c0_i32 = arith.constant 0 : i32
    %2 = arith.minsi %1, %c0_i32 : i32
    %c0_i32_0 = arith.constant 0 : i32
    %c0_i32_1 = arith.constant 0 : i32
    return %2, %c0_i32_0 : i32, i32
  }
  func.func @transform_2(%arg0: i32, %arg1: i32) -> (i32, i32) {
    %c0_i32 = arith.constant 0 : i32
    %c0_i32_0 = arith.constant 0 : i32
    return %arg0, %c0_i32 : i32, i32
  }
  func.func @transform_3(%arg0: i32, %arg1: i32) -> (i32, i32) {
    %c0_i32 = arith.constant 0 : i32
    %c0_i32_0 = arith.constant 0 : i32
    return %arg0, %c0_i32 : i32, i32
  }
}

</mosaic_0001>

<bundles_post_ra>
// kernel: loss_iou_pallas.1
= control target key start
LH: loop header
LB: loop body
LE: loop exit
PB: predicated region body
PF: predicated region fallthrough
CT: control target
= control target key end

     0   :  { %v136_v8 = vmov 0   ;;  %s175_s0 = inlined_call_operand.vmem [shape: f32[16,128], index: 0, kind: input, shape index: {}]   ;;  %s176_s1 = inlined_call_operand.vmem [shape: f32[16,128], index: 1, kind: input, shape index: {}]   ;;  %s177_s2 = inlined_call_operand.vmem [shape: s32[8,128], index: 2, kind: output, shape index: {0}]   ;;  %s178_s3 = inlined_call_operand.vmem [shape: s32[8,128], index: 3, kind: output, shape index: {1}]  }
   0x1   :  { %v83_v0 = vld [vmem:[%s175_s0] sm:$0xff]  ;;  %v84_v1 = vld [vmem:[%s175_s0 + $0x8] sm:$0xff] }
   0x2   :  { %v87_v2 = vld [vmem:[%s176_s1] sm:$0xff]  ;;  %vm85_vm0 = vcmp.ge.f32.partialorder %v83_v0, -1.3862944  ;;  %v88_v3 = vld [vmem:[%s176_s1 + $0x8] sm:$0xff]  ;;  %vm86_vm2 = vcmp.ge.f32.partialorder %v84_v1, -1.3862944 }
   0x3   :  { %vm125_vm1 = vcmp.lt.s32.totalorder %v87_v2, 0  ;;  %v126_v4 = vceil.f32 %v87_v2  ;;  %v127_v5 = vfloor.f32 %v87_v2  ;;  %vm130_vm3 = vcmp.lt.s32.totalorder %v88_v3, 0 }
   0x4   :  { %v131_v6 = vceil.f32 %v88_v3  ;;  %v132_v7 = vfloor.f32 %v88_v3  ;;  %v91_v9 = vsel %vm85_vm0, 1, %v136_v8  ;;  %v92_v11 = vsel %vm86_vm2, 1, %v136_v8 }
   0x5   :  { %v128_v10 = vsel %vm125_vm1, %v126_v4, %v127_v5 }
   0x6   :  { %v129_v12 = vcvt.f32.s32 %v128_v10  ;;  %v133_v13 = vsel %vm130_vm3, %v131_v6, %v132_v7 }
   0x7   :  { %v134_v14 = vcvt.f32.s32 %v133_v13 }
   0x8   :  { %v93_v15 = vand.u32 %v129_v12, %v91_v9  ;;  %v95_v16 = vor.u32 %v129_v12, %v91_v9 }
   0x9   :  { %v94_v17 = vand.u32 %v134_v14, %v92_v11  ;;  %v96_v18 = vor.u32 %v134_v14, %v92_v11 }
   0xb   :  { %v98_v19 = vadd.s32 %v94_v17, %v93_v15  ;;  %v102_v20 = vadd.s32 %v96_v18, %v95_v16 }
   0xd   :  { %100 = vst [vmem:[%s177_s2] sm:$0xff] %v98_v19 }
   0xe   :  { %104 = vst [vmem:[%s178_s3] sm:$0xff] %v102_v20 }

</bundles_post_ra>
